<compile_context>
chip_gen: v7x
topology: tpu7x:2x2x1
jax: 0.10.0
libtpu: 0.0.40
codegen_flags: <defaults>
</compile_context>

<pallas_src>
import jax
import jax.numpy as jnp
from jax.experimental import pallas as pl
from jax.experimental.pallas import tpu as pltpu


def _lr_kernel_softmax(x_ref, w_ref, b_ref, o_ref):
    # x_ref: (TILE_B, F) bf16, w_ref: (F, C_pad) bf16 (pre-transposed),
    # b_ref: (1, C_pad) f32 (padded lanes = -1e30), o_ref: (TILE_B, C_pad) f32.
    logits = jnp.dot(
        x_ref[...], w_ref[...], preferred_element_type=jnp.float32
    ) + b_ref[...]
    # Numerically stable softmax over the class (lane) axis, all in f32.
    m = jnp.max(logits, axis=1, keepdims=True)
    e = jnp.exp(logits - m)                       # padded lanes -> exp(-huge) == 0
    denom = jnp.sum(e, axis=1, keepdims=True)
    o_ref[...] = (e * pl.reciprocal(denom, approx=True)).astype(o_ref.dtype)


def _lr_kernel_linear(x_ref, w_ref, b_ref, o_ref):
    logits = jnp.dot(
        x_ref[...], w_ref[...], preferred_element_type=jnp.float32
    ) + b_ref[...]
    o_ref[...] = logits.astype(o_ref.dtype)


def logistic_regression_forward(x, weight, bias, softmax=True, *,
                                compute_dtype=jnp.bfloat16, tile_b=None):
    """Forward pass of LogisticRegression.

    x:      [B, F]   (any float dtype; cast to `compute_dtype` for the MXU)
    weight: [C, F]   (nn.Linear layout: [out_features, in_features])
    bias:   [C]
    returns [B, C] in x.dtype
    """
    B, F = x.shape
    C, F2 = weight.shape
    assert F == F2, "weight must be [nb_classes, nb_feat]"

    LANES = 128
    c_pad = ((C + LANES - 1) // LANES) * LANES          # lane-dense class axis

    if tile_b is None:
        # Size the batch tile against a conservative VMEM budget:
        # resident W (bf16) + bias + 2x (double-buffered) x tile (bf16)
        # + 2x out tile (f32), with headroom under the 32 MiB scoped default.
        budget = 24 * 1024 * 1024
        resident = F * c_pad * 2 + c_pad * 4
        per_row = 2 * (F * 2) + 2 * (c_pad * 4)
        tile_b = max(8, min(1024, (budget - resident) // max(per_row, 1)))
        tile_b = min(tile_b, ((B + 7) // 8) * 8)
    tile_b = max(8, (tile_b // 8) * 8)
    b_pad = ((B + tile_b - 1) // tile_b) * tile_b
    grid = (b_pad // tile_b,)

    # One-time layout plumbing in the wrapper (not per-grid-step work):
    #   pre-transposed weight [F, C_pad] (zero-padded cols, bf16);
    #   bias [1, C_pad] f32, padded lanes masked to -1e30 when softmax-ing.
    w_t = jnp.pad(weight.T.astype(compute_dtype), ((0, 0), (0, c_pad - C)))
    pad_val = -1e30 if softmax else 0.0
    b_p = jnp.pad(bias.astype(jnp.float32)[None, :], ((0, 0), (0, c_pad - C)),
                  constant_values=pad_val)

    x_p = x.astype(compute_dtype)
    if b_pad != B:
        x_p = jnp.pad(x_p, ((0, b_pad - B), (0, 0)))

    kernel = _lr_kernel_softmax if softmax else _lr_kernel_linear

    out = pl.pallas_call(
        kernel,
        out_shape=jax.ShapeDtypeStruct((b_pad, c_pad), jnp.float32),
        grid=grid,
        in_specs=[
            pl.BlockSpec((tile_b, F), lambda i: (i, 0)),   # x tile, pipelined
            pl.BlockSpec((F, c_pad), lambda i: (0, 0)),    # weight, VMEM-resident
            pl.BlockSpec((1, c_pad), lambda i: (0, 0)),    # bias,   VMEM-resident
        ],
        out_specs=pl.BlockSpec((tile_b, c_pad), lambda i: (i, 0)),
        compiler_params=pltpu.CompilerParams(
            dimension_semantics=("parallel",),
            vmem_limit_bytes=32 * 1024 * 1024,
        ),
    )(x_p, w_t, b_p)

    # Slice off batch/class padding outside the kernel.
    return out[:B, :C].astype(x.dtype)


if __name__ == "__main__":
    # Deterministic setup: batch=8, nb_feat=32, nb_classes=16, softmax=True
    key = jax.random.PRNGKey(0)
    kx, kw, kb = jax.random.split(key, 3)

    B, NB_FEAT, NB_CLASSES = 8, 32, 16
    x = jax.random.normal(kx, (B, NB_FEAT), dtype=jnp.float32)
    # nn.Linear default init: U(-1/sqrt(in), 1/sqrt(in)).
    bound = 1.0 / (NB_FEAT ** 0.5)
    weight = jax.random.uniform(
        kw, (NB_CLASSES, NB_FEAT), minval=-bound, maxval=bound, dtype=jnp.float32
    )
    bias = jax.random.uniform(
        kb, (NB_CLASSES,), minval=-bound, maxval=bound, dtype=jnp.float32
    )

    out = logistic_regression_forward(x, weight, bias, softmax=True)
    out = jax.block_until_ready(out)

    # Reference with the same bf16-input / f32-accumulation matmul semantics.
    ref_logits = jnp.dot(
        x.astype(jnp.bfloat16), weight.T.astype(jnp.bfloat16),
        preferred_element_type=jnp.float32,
    ) + bias
    ref = jax.nn.softmax(ref_logits, axis=1)

    assert out.shape == (B, NB_CLASSES)
    # Tolerance covers the EUP approximate reciprocal in the softmax denom.
    assert jnp.allclose(out, ref, atol=5e-3, rtol=5e-3)
    assert jnp.allclose(jnp.sum(out, axis=1), 1.0, atol=5e-3)

    print("KERNEL_OK")
</pallas_src>

<mosaic_0001>
module attributes {stable_mosaic.version = 11 : i64} {
  func.func @_lr_kernel_softmax(%arg0: i32, %arg1: memref<8x32xbf16, #tpu.memory_space<vmem>>, %arg2: memref<32x128xbf16, #tpu.memory_space<vmem>>, %arg3: memref<1x128xf32, #tpu.memory_space<vmem>>, %arg4: memref<8x128xf32, #tpu.memory_space<vmem>>) attributes {dimension_semantics = [#tpu.dimension_semantics<parallel>], iteration_bounds = array<i64: 1>, scalar_prefetch = 0 : i64, scratch_operands = 0 : i64, tpu.core_type = #tpu.core_type<tc>, window_params = [{transform_indices = @transform_0, window_bounds = array<i64: 8, 32>}, {pipeline_mode = #tpu.pipeline_mode<synchronous>, transform_indices = @transform_1, window_bounds = array<i64: 32, 128>}, {pipeline_mode = #tpu.pipeline_mode<synchronous>, transform_indices = @transform_2, window_bounds = array<i64: 1, 128>}, {transform_indices = @transform_3, window_bounds = array<i64: 8, 128>}]} {
    %c0 = arith.constant 0 : index
    %c0_0 = arith.constant 0 : index
    %0 = vector.load %arg1[%c0, %c0_0] : memref<8x32xbf16, #tpu.memory_space<vmem>>, vector<8x32xbf16>
    %c0_1 = arith.constant 0 : index
    %c0_2 = arith.constant 0 : index
    %1 = vector.load %arg2[%c0_1, %c0_2] : memref<32x128xbf16, #tpu.memory_space<vmem>>, vector<32x128xbf16>
    %cst = arith.constant dense<0.000000e+00> : vector<8x128xf32>
    %2 = tpu.matmul %0, %1, %cst {dimension_numbers = #tpu.dot_dimension_numbers<[1], [0], [0], [1], [0, 0, 1, 1], [], []>} : vector<8x32xbf16>, vector<32x128xbf16>, vector<8x128xf32> -> vector<8x128xf32>
    %c0_3 = arith.constant 0 : index
    %c0_4 = arith.constant 0 : index
    %3 = vector.load %arg3[%c0_3, %c0_4] : memref<1x128xf32, #tpu.memory_space<vmem>>, vector<1x128xf32>
    %4 = vector.broadcast %3 : vector<1x128xf32> to vector<8x128xf32>
    %5 = arith.addf %2, %4 : vector<8x128xf32>
    %cst_5 = arith.constant dense<0xFF800000> : vector<8xf32>
    %6 = vector.multi_reduction <maximumf>, %5, %cst_5 [1] : vector<8x128xf32> to vector<8xf32>
    %7 = vector.shape_cast %6 : vector<8xf32> to vector<8x1xf32>
    %8 = vector.broadcast %7 : vector<8x1xf32> to vector<8x128xf32>
    %9 = arith.subf %5, %8 : vector<8x128xf32>
    %10 = math.exp %9 : vector<8x128xf32>
    %cst_6 = arith.constant dense<0.000000e+00> : vector<8xf32>
    %11 = vector.multi_reduction <add>, %10, %cst_6 [1] : vector<8x128xf32> to vector<8xf32>
    %12 = vector.shape_cast %11 : vector<8xf32> to vector<8x1xf32>
    %13 = tpu.reciprocal %12 {approx = true} : vector<8x1xf32> -> vector<8x1xf32>
    %14 = vector.broadcast %13 : vector<8x1xf32> to vector<8x128xf32>
    %15 = arith.mulf %10, %14 : vector<8x128xf32>
    %c0_7 = arith.constant 0 : index
    %c0_8 = arith.constant 0 : index
    %16 = vector.load %arg4[%c0_7, %c0_8] : memref<8x128xf32, #tpu.memory_space<vmem>>, vector<8x128xf32>
    tpu.vector_store %arg4[%c0_7, %c0_8], %15 {strides = array<i32>} : memref<8x128xf32, #tpu.memory_space<vmem>>, vector<8x128xf32>,
    return
  }
  func.func @transform_0(%arg0: i32) -> (i32, i32) {
    %c0_i32 = arith.constant 0 : i32
    %c0_i32_0 = arith.constant 0 : i32
    return %arg0, %c0_i32 : i32, i32
  }
  func.func @transform_1(%arg0: i32) -> (i32, i32) {
    %c0_i32 = arith.constant 0 : i32
    %c0_i32_0 = arith.constant 0 : i32
    %c0_i32_1 = arith.constant 0 : i32
    return %c0_i32, %c0_i32_0 : i32, i32
  }
  func.func @transform_2(%arg0: i32) -> (i32, i32) {
    %c0_i32 = arith.constant 0 : i32
    %c0_i32_0 = arith.constant 0 : i32
    %c0_i32_1 = arith.constant 0 : i32
    return %c0_i32, %c0_i32_0 : i32, i32
  }
  func.func @transform_3(%arg0: i32) -> (i32, i32) {
    %c0_i32 = arith.constant 0 : i32
    %c0_i32_0 = arith.constant 0 : i32
    return %arg0, %c0_i32 : i32, i32
  }
}

</mosaic_0001>

<bundles_post_ra>
// kernel: tpu_custom_call.1
= control target key start
LH: loop header
LB: loop body
LE: loop exit
PB: predicated region body
PF: predicated region fallthrough
CT: control target
= control target key end

     0   :  { %8 = vsyncpa [#allocation3], 0  ;;  %s309_s0 = inlined_call_operand.hbm [shape: bf16[8,32], index: 0, kind: input, shape index: {}]   ;;  %s310_s1 = inlined_call_operand.hbm [shape: bf16[32,128], index: 1, kind: input, shape index: {}]   ;;  %s311_s2 = inlined_call_operand.vmem [shape: f32[1,128], index: 2, kind: input, shape index: {}]   ;;  %s312_s3 = inlined_call_operand.hbm [shape: f32[8,128], index: 3, kind: output, shape index: {}]  }
   0x1   :  { %9 = vsyncpa [#allocation6], 0 }
   0x2   :  { %10 = vsyncpa [#allocation4], 0  ;;  %s236_s12 = smov [#allocation2]   ;;  %s237_s14 = smov [#allocation5]  }
   0x3   :  { %s17_s13 = sshll.u32 %s236_s12, 4  ;;  %s26_s15 = sshll.u32 %s237_s14, 4  ;;  %s18_s13 = int_to_ptr.vmem [resolvable:$true] %s17_s13  ;;  %s263_s15 = int_to_ptr.vmem [resolvable:$true] %s26_s15 }
   0x4   :  { %s164_s18 = scalar_lea.hbm %s309_s0, 64 }
   0x5   :  { %p165_p0 = scmp.ne.s32.totalorder %s309_s0, %s164_s18  ;;  %p168_p1 = scmp.lt.u32.totalorder %s164_s18, %s309_s0 }
   0x7   :  { %p170_p2 = pnand %p168_p1, %p165_p0 }
   0x9   :  { %173 = shalt.err (!%p170_p2)
}
   0xa   :  { %s174_s23 = scalar_lea.vmem %s18_s13, 64  ;;  %p179_p4 = scmp.lt.s32.totalorder %s18_s13, %s18_s13 }
   0xb   :  { %p175_p3 = scmp.ne.s32.totalorder %s18_s13, %s174_s23  ;;  %p180_p5 = scmp.lt.s32.totalorder %s174_s23, %s174_s23 }
   0xd   :  { %p181_p6 = por %p180_p5, %p179_p4 }
   0xf   :  { %p182_p7 = pnand %p181_p6, %p175_p3 }
  0x11   :  { %185 = shalt.err (!%p182_p7)
}
  0x12   :  { %20 = dma.hbm_to_vmem [thread:$0]  %s309_s0, 64, %s18_s13, [#allocation3]  }
  0x13   :  { %s186_s28 = scalar_lea.hbm %s310_s1, 256 }
  0x14   :  { %p187_p8 = scmp.ne.s32.totalorder %s310_s1, %s186_s28  ;;  %p190_p9 = scmp.lt.u32.totalorder %s186_s28, %s310_s1 }
  0x16   :  { %p192_p10 = pnand %p190_p9, %p187_p8 }
  0x18   :  { %195 = shalt.err (!%p192_p10)
}
  0x19   :  { %s196_s6 = scalar_lea.vmem %s263_s15, 256  ;;  %p201_p12 = scmp.lt.s32.totalorder %s263_s15, %s263_s15 }
  0x1a   :  { %p197_p11 = scmp.ne.s32.totalorder %s263_s15, %s196_s6  ;;  %p202_p13 = scmp.lt.s32.totalorder %s196_s6, %s196_s6 }
  0x1c   :  { %p203_p0 = por %p202_p13, %p201_p12 }
  0x1e   :  { %p204_p1 = pnand %p203_p0, %p197_p11 }
  0x20   :  { %207 = shalt.err (!%p204_p1)
}
  0x21   :  { %s238_s0 = smov 64   ;;  %s239_s7 = smov 4  }
  0x22   :  { %32 = dma.hbm_to_vmem [thread:$0]  %s310_s1, 256, %s263_s15, [#allocation6], %s238_s0, %s238_s0, %s239_s7  }
  0x23   :  { %230 = dma.done.wait [#allocation3], 64  }
  0x24   :  { %231 = vsyncadd [#allocation3], 4294967232 }
  0x25   :  { %232 = dma.done.wait [#allocation6], 256  }
  0x26   :  { %233 = vsyncadd [#allocation6], 4294967040  ;;  %v240_v0 = vmov 0.0   ;;  %vm241_vm0 = vmmov 0   ;;  %v158_v1 = vld [vmem:[#allocation5] sm:$0xff]   ;;  %v159_v2 = vld [vmem:[#allocation5 + $0x8] sm:$0xff]  }
  0x27   :  { %143 = vmatprep.subr.bf16.mxu0 %v240_v0  ;;  %147 = vmatprep.mubr.msk.bf16.mxu0 %vm241_vm0, %v240_v0  ;;  %v42_v3 = vld [vmem:[#allocation2] sm:$0xf]  ;;  %vm66_vm1 = vcmask 261120   ;;  %s242_s1 = smov [#allocation7]  }
  0x28   :  { %144 = vmatpush3.bf16.msra.mxu0 %v158_v1  ;;  %v136_v4 = vld [vmem:[%s311_s2] ss:$0 sm:$0xff]  ;;  %s126_s12 = sshll.u32 %s242_s1, 4  ;;  %s127_s12 = int_to_ptr.vmem [resolvable:$true] %s126_s12 }
  0x29   :  { %145 = vmatprep.subr.bf16.mxu0 %v240_v0  ;;  %s208_s2 = scalar_lea.vmem %s127_s12, 128  ;;  %p213_p3 = scmp.lt.s32.totalorder %s127_s12, %s127_s12 }
  0x2a   :  { %p209_p2 = scmp.ne.s32.totalorder %s127_s12, %s208_s2  ;;  %p214_p4 = scmp.lt.s32.totalorder %s208_s2, %s208_s2 }
  0x2c   :  { %146 = vmatpush3.bf16.msra.mxu0 %v159_v2  ;;  %p215_p5 = por %p214_p4, %p213_p3 }
  0x2e   :  { %p216_p6 = pnand %p215_p5, %p209_p2 }
  0x2f   :  { %148 = vmatmul.mubr.msk.bf16.vlgmr.msra.gmra.mrb[0].mxu0 %vm66_vm1, %v42_v3 }
 0x102   :  { %v104_v5 = vpop.f32.mrb[0].mxu0 }
 0x103   :  { %v105_v6 = vadd.f32 %v136_v4, %v104_v5  ;;  %v149_v7 = vpop.f32.mrb[1].mxu0 }
 0x104   :  { %v107_v8 = vpop.f32.mrb[2].mxu0 }
 0x105   :  { %110 = vmax.xlane.f32.xlu0 %v105_v6  ;;  %v150_v9 = vpop.f32.mrb[3].mxu0 }
 0x192   :  { %v111_v10 = vpop.xlane.xlu0 %110 }
 0x193   :  { %v112_v11 = vsub.f32 %v105_v6, %v111_v10 }
 0x195   :  { %v113_v12 = vmul.f32 1.442695, %v112_v11 }
 0x197   :  { %160 = vpow2.f32 %v113_v12 }
 0x1a1   :  { %v161_v13 = vpop.eup %160 }
 0x1a2   :  { %115 = vadd.xlane.f32.xlu0 %v161_v13 }
 0x22f   :  { %v116_v14 = vpop.xlane.xlu0 %115 }
 0x230   :  { %162 = vrcp.f32 %v116_v14 }
 0x23a   :  { %v163_v15 = vpop.eup %162 }
 0x23b   :  { %v118_v16 = vmul.f32 %v163_v15, %v161_v13 }
 0x23d   :  { %119 = vst [vmem:[#allocation7] sm:$0xff] %v118_v16 }
 0x23e   :  { %219 = shalt.err (!%p216_p6)
}
 0x23f   :  { %s220_s15 = scalar_lea.hbm %s312_s3, 128 }
 0x240   :  { %p221_p7 = scmp.ne.s32.totalorder %s312_s3, %s220_s15  ;;  %p224_p8 = scmp.lt.u32.totalorder %s220_s15, %s312_s3 }
 0x242   :  { %p226_p9 = pnand %p224_p8, %p221_p7 }
 0x244   :  { %229 = shalt.err (!%p226_p9)
}
 0x245   :  { %129 = dma.vmem_to_hbm [thread:$0]  %s127_s12, 128, %s312_s3, [#allocation4]  }
 0x246   :  { %234 = dma.done.wait [#allocation4], 128  }
 0x247   :  { %235 = vsyncadd [#allocation4], 4294967168 }
 0x248   :  { %133 = vsyncpa [#allocation3], 1 }
 0x249   :  { %134 = vsyncpa [#allocation6], 1 }
 0x24a   :  { %135 = vsyncpa [#allocation4], 1 }

</bundles_post_ra>
